<compile_context>
chip_gen: v7x
topology: tpu7x:2x2x1
jax: 0.10.0
libtpu: 0.0.40
codegen_flags: <defaults>
</compile_context>

<pallas_src>
import jax
import jax.numpy as jnp
from jax.experimental import pallas as pl
from jax.experimental.pallas import tpu as pltpu


F0, F1, F2, F3 = 1, 124, 248, 1          # logical feature sizes
F1P, F2P = 128, 256                       # lane/sublane-padded feature sizes
LANE = 128
TB_MAX = 4096                             # max batch rows (lanes) per grid step


def _cdiv(a, b):
    return -(-a // b)


# ----------------------------- Pallas kernel -------------------------------

def _mlp_kernel(x_ref, w1_ref, b1_ref, w2t_ref, b2_ref, w3_ref, b3_ref, o_ref):
    # x_ref: (1, TB)  -- batch in the lane dimension.
    x_row = x_ref[...]

    # Layer 1 (fan-in = 1): VPU broadcast multiply.
    #   (F1P, 1) * (1, TB) + (F1P, 1) -> (F1P, TB)
    h1 = jnp.maximum(w1_ref[...] * x_row + b1_ref[...], 0.0)

    # Layer 2: MXU matmul, bf16 operands, f32 accumulation.
    #   (F2P, F1P) @ (F1P, TB) -> (F2P, TB)
    h2 = jnp.dot(w2t_ref[...], h1.astype(jnp.bfloat16),
                 preferred_element_type=jnp.float32)
    h2 = jnp.maximum(h2 + b2_ref[...], 0.0)

    # Layer 3 (fan-out = 1): MXU matvec -> lane-dense (1, TB) output row.
    #   (1, F2P) @ (F2P, TB) -> (1, TB)
    out = jnp.dot(w3_ref[...], h2.astype(jnp.bfloat16),
                  preferred_element_type=jnp.float32)
    o_ref[...] = out + b3_ref[0, 0]


# ------------------------ Parameter prep (one-time) --------------------------

def prepare_params(params):
    """Pad / transpose / bf16-cast weights once.  Call outside the per-step forward."""
    (w1, b1), (w2, b2), (w3, b3) = params["fc1"], params["fc2"], params["fc3"]
    # fc1 (fan-in 1): weight & bias as columns so they broadcast against the batch row.
    w1c = jnp.zeros((F1P, 1), jnp.float32).at[:F1, 0].set(w1[0, :])      # (128, 1)
    b1c = jnp.zeros((F1P, 1), jnp.float32).at[:F1, 0].set(b1)            # (128, 1)
    # fc2: stored transposed (out, in) = (256, 128), bf16 for the MXU.
    w2t = (jnp.zeros((F2P, F1P), jnp.float32)
           .at[:F2, :F1].set(w2.T)).astype(jnp.bfloat16)                 # (256, 128) bf16
    b2c = jnp.zeros((F2P, 1), jnp.float32).at[:F2, 0].set(b2)            # (256, 1)
    # fc3 (fan-out 1): weight as a row, bf16.
    w3r = (jnp.zeros((1, F2P), jnp.float32)
           .at[0, :F2].set(w3[:, 0])).astype(jnp.bfloat16)               # (1, 256) bf16
    b3s = jnp.reshape(b3, (1, 1)).astype(jnp.float32)                    # SMEM scalar
    return (w1c, b1c, w2t, b2c, w3r, b3s)


# ------------------------------- Forward ------------------------------------

@jax.jit
def reward_model_forward(x, padded_params):
    """x: (B, 1) float32.  padded_params: output of prepare_params.  Returns (B, 1)."""
    w1c, b1c, w2t, b2c, w3r, b3s = padded_params
    B = x.shape[0]
    xf = x.reshape(-1).astype(jnp.float32)

    # ~Equal-sized 128-aligned lane tiles, TB <= TB_MAX, and >= 2 grid steps so the
    # "parallel" grid axis can shard across both v7x TensorCores.
    n_tiles = _cdiv(B, LANE)
    g = max(2, _cdiv(n_tiles, TB_MAX // LANE))
    TB = _cdiv(n_tiles, g) * LANE
    Bp = g * TB

    xp = jnp.pad(xf, (0, Bp - B)).reshape(g, 1, TB)

    row_spec = pl.BlockSpec((None, 1, TB), lambda i: (i, 0, 0))   # lane-dense row block
    const = lambda shape: pl.BlockSpec(shape, lambda i: (0, 0))   # weights stay resident

    out_p = pl.pallas_call(
        _mlp_kernel,
        out_shape=jax.ShapeDtypeStruct((g, 1, TB), jnp.float32),
        grid=(g,),
        in_specs=[
            row_spec,                                             # x       (1, TB)
            const((F1P, 1)),                                      # w1 col  (128, 1)
            const((F1P, 1)),                                      # b1 col  (128, 1)
            const((F2P, F1P)),                                    # w2^T    (256, 128) bf16
            const((F2P, 1)),                                      # b2 col  (256, 1)
            const((1, F2P)),                                      # w3 row  (1, 256) bf16
            pl.BlockSpec(memory_space=pltpu.MemorySpace.SMEM),    # b3 scalar
        ],
        out_specs=row_spec,
        compiler_params=pltpu.CompilerParams(
            dimension_semantics=("parallel",),
            vmem_limit_bytes=32 * 1024 * 1024),
    )(xp, w1c, b1c, w2t, b2c, w3r, b3s)

    return out_p.reshape(Bp)[:B].reshape(B, 1)


# --------------------------- Parameter init ---------------------------------

def init_params(key):
    """Mirrors nn.Linear's default U(-1/sqrt(fan_in), 1/sqrt(fan_in)) init."""
    def linear(key, fan_in, fan_out):
        kw, kb = jax.random.split(key)
        bound = 1.0 / jnp.sqrt(fan_in)
        w = jax.random.uniform(kw, (fan_in, fan_out), jnp.float32, -bound, bound)
        b = jax.random.uniform(kb, (fan_out,), jnp.float32, -bound, bound)
        return w, b

    k1, k2, k3 = jax.random.split(key, 3)
    return {
        "fc1": linear(k1, F0, F1),
        "fc2": linear(k2, F1, F2),
        "fc3": linear(k3, F2, F3),
    }


# -------------------------------- Main ---------------------------------------

if __name__ == "__main__":
    key = jax.random.PRNGKey(0)
    pkey, xkey = jax.random.split(key)

    params = init_params(pkey)
    padded = prepare_params(params)                      # one-time padding / bf16 cast
    x = jax.random.normal(xkey, (8, 1), jnp.float32)     # batch=8, feature=1

    out = reward_model_forward(x, padded)
    jax.block_until_ready(out)

    # Pure-JAX f32 reference (kernel runs fc2/fc3 in bf16 -> loosened tolerance).
    def ref(x, params):
        (w1, b1), (w2, b2), (w3, b3) = params["fc1"], params["fc2"], params["fc3"]
        h = jnp.maximum(x @ w1 + b1, 0.0)
        h = jnp.maximum(h @ w2 + b2, 0.0)
        return h @ w3 + b3

    expected = ref(x, params)
    assert out.shape == (8, 1), out.shape
    assert jnp.allclose(out, expected, atol=2e-2, rtol=2e-2), (out, expected)

    print("KERNEL_OK")
</pallas_src>

<mosaic_0001>
module attributes {stable_mosaic.version = 11 : i64} {
  func.func @_mlp_kernel(%arg0: i32, %arg1: memref<1x1x128xf32, #tpu.memory_space<vmem>>, %arg2: memref<128x1xf32, #tpu.memory_space<vmem>>, %arg3: memref<128x1xf32, #tpu.memory_space<vmem>>, %arg4: memref<256x128xbf16, #tpu.memory_space<vmem>>, %arg5: memref<256x1xf32, #tpu.memory_space<vmem>>, %arg6: memref<1x256xbf16, #tpu.memory_space<vmem>>, %arg7: memref<1x1xf32, #tpu.memory_space<smem>>, %arg8: memref<1x1x128xf32, #tpu.memory_space<vmem>>) attributes {dimension_semantics = [#tpu.dimension_semantics<parallel>], iteration_bounds = array<i64: 2>, scalar_prefetch = 0 : i64, scratch_operands = 0 : i64, tpu.core_type = #tpu.core_type<tc>, window_params = [{transform_indices = @transform_0, window_bounds = array<i64: 1, 1, 128>}, {pipeline_mode = #tpu.pipeline_mode<synchronous>, transform_indices = @transform_1, window_bounds = array<i64: 128, 1>}, {pipeline_mode = #tpu.pipeline_mode<synchronous>, transform_indices = @transform_2, window_bounds = array<i64: 128, 1>}, {pipeline_mode = #tpu.pipeline_mode<synchronous>, transform_indices = @transform_3, window_bounds = array<i64: 256, 128>}, {pipeline_mode = #tpu.pipeline_mode<synchronous>, transform_indices = @transform_4, window_bounds = array<i64: 256, 1>}, {pipeline_mode = #tpu.pipeline_mode<synchronous>, transform_indices = @transform_5, window_bounds = array<i64: 1, 256>}, {transform_indices = @transform_6, window_bounds = array<i64: 1, 1>}, {transform_indices = @transform_7, window_bounds = array<i64: 1, 1, 128>}]} {
    %c0 = arith.constant 0 : index
    %c0_0 = arith.constant 0 : index
    %c0_1 = arith.constant 0 : index
    %0 = vector.load %arg1[%c0, %c0_0, %c0_1] : memref<1x1x128xf32, #tpu.memory_space<vmem>>, vector<1x1x128xf32>
    %1 = vector.shape_cast %0 : vector<1x1x128xf32> to vector<1x128xf32>
    %c0_2 = arith.constant 0 : index
    %c0_3 = arith.constant 0 : index
    %2 = vector.load %arg2[%c0_2, %c0_3] : memref<128x1xf32, #tpu.memory_space<vmem>>, vector<128x1xf32>
    %3 = vector.broadcast %2 : vector<128x1xf32> to vector<128x128xf32>
    %4 = vector.broadcast %1 : vector<1x128xf32> to vector<128x128xf32>
    %5 = arith.mulf %3, %4 : vector<128x128xf32>
    %c0_4 = arith.constant 0 : index
    %c0_5 = arith.constant 0 : index
    %6 = vector.load %arg3[%c0_4, %c0_5] : memref<128x1xf32, #tpu.memory_space<vmem>>, vector<128x1xf32>
    %7 = vector.broadcast %6 : vector<128x1xf32> to vector<128x128xf32>
    %8 = arith.addf %5, %7 : vector<128x128xf32>
    %cst = arith.constant 0.000000e+00 : f32
    %9 = vector.broadcast %cst : f32 to vector<128x128xf32>
    %10 = arith.maximumf %8, %9 : vector<128x128xf32>
    %c0_6 = arith.constant 0 : index
    %c0_7 = arith.constant 0 : index
    %11 = vector.load %arg4[%c0_6, %c0_7] : memref<256x128xbf16, #tpu.memory_space<vmem>>, vector<256x128xbf16>
    %12 = arith.truncf %10 : vector<128x128xf32> to vector<128x128xbf16>
    %cst_8 = arith.constant dense<0.000000e+00> : vector<256x128xf32>
    %13 = tpu.matmul %11, %12, %cst_8 {dimension_numbers = #tpu.dot_dimension_numbers<[1], [0], [0], [1], [0, 0, 1, 1], [], []>} : vector<256x128xbf16>, vector<128x128xbf16>, vector<256x128xf32> -> vector<256x128xf32>
    %c0_9 = arith.constant 0 : index
    %c0_10 = arith.constant 0 : index
    %14 = vector.load %arg5[%c0_9, %c0_10] : memref<256x1xf32, #tpu.memory_space<vmem>>, vector<256x1xf32>
    %15 = vector.broadcast %14 : vector<256x1xf32> to vector<256x128xf32>
    %16 = arith.addf %13, %15 : vector<256x128xf32>
    %cst_11 = arith.constant 0.000000e+00 : f32
    %17 = vector.broadcast %cst_11 : f32 to vector<256x128xf32>
    %18 = arith.maximumf %16, %17 : vector<256x128xf32>
    %c0_12 = arith.constant 0 : index
    %c0_13 = arith.constant 0 : index
    %19 = vector.load %arg6[%c0_12, %c0_13] : memref<1x256xbf16, #tpu.memory_space<vmem>>, vector<1x256xbf16>
    %20 = arith.truncf %18 : vector<256x128xf32> to vector<256x128xbf16>
    %cst_14 = arith.constant dense<0.000000e+00> : vector<1x128xf32>
    %21 = tpu.matmul %19, %20, %cst_14 {dimension_numbers = #tpu.dot_dimension_numbers<[1], [0], [0], [1], [0, 0, 1, 1], [], []>} : vector<1x256xbf16>, vector<256x128xbf16>, vector<1x128xf32> -> vector<1x128xf32>
    %c0_15 = arith.constant 0 : index
    %c0_16 = arith.constant 0 : index
    %22 = memref.load %arg7[%c0_15, %c0_16] : memref<1x1xf32, #tpu.memory_space<smem>>
    %23 = vector.broadcast %22 : f32 to vector<1x128xf32>
    %24 = arith.addf %21, %23 : vector<1x128xf32>
    %c0_17 = arith.constant 0 : index
    %c0_18 = arith.constant 0 : index
    %c0_19 = arith.constant 0 : index
    %25 = vector.load %arg8[%c0_17, %c0_18, %c0_19] : memref<1x1x128xf32, #tpu.memory_space<vmem>>, vector<1x1x128xf32>
    %26 = vector.shape_cast %25 : vector<1x1x128xf32> to vector<1x128xf32>
    %27 = vector.shape_cast %24 : vector<1x128xf32> to vector<1x1x128xf32>
    tpu.vector_store %arg8[%c0_17, %c0_18, %c0_19], %27 {strides = array<i32>} : memref<1x1x128xf32, #tpu.memory_space<vmem>>, vector<1x1x128xf32>,
    return
  }
  func.func @transform_0(%arg0: i32) -> (i32, i32, i32) {
    %c0_i32 = arith.constant 0 : i32
    %c0_i32_0 = arith.constant 0 : i32
    %c0_i32_1 = arith.constant 0 : i32
    return %arg0, %c0_i32, %c0_i32_0 : i32, i32, i32
  }
  func.func @transform_1(%arg0: i32) -> (i32, i32) {
    %c0_i32 = arith.constant 0 : i32
    %c0_i32_0 = arith.constant 0 : i32
    %c0_i32_1 = arith.constant 0 : i32
    return %c0_i32, %c0_i32_0 : i32, i32
  }
  func.func @transform_2(%arg0: i32) -> (i32, i32) {
    %c0_i32 = arith.constant 0 : i32
    %c0_i32_0 = arith.constant 0 : i32
    %c0_i32_1 = arith.constant 0 : i32
    return %c0_i32, %c0_i32_0 : i32, i32
  }
  func.func @transform_3(%arg0: i32) -> (i32, i32) {
    %c0_i32 = arith.constant 0 : i32
    %c0_i32_0 = arith.constant 0 : i32
    %c0_i32_1 = arith.constant 0 : i32
    return %c0_i32, %c0_i32_0 : i32, i32
  }
  func.func @transform_4(%arg0: i32) -> (i32, i32) {
    %c0_i32 = arith.constant 0 : i32
    %c0_i32_0 = arith.constant 0 : i32
    %c0_i32_1 = arith.constant 0 : i32
    return %c0_i32, %c0_i32_0 : i32, i32
  }
  func.func @transform_5(%arg0: i32) -> (i32, i32) {
    %c0_i32 = arith.constant 0 : i32
    %c0_i32_0 = arith.constant 0 : i32
    %c0_i32_1 = arith.constant 0 : i32
    return %c0_i32, %c0_i32_0 : i32, i32
  }
  func.func @transform_6(%arg0: i32) -> (i32, i32) {
    %c0_i32 = arith.constant 0 : i32
    %c0_i32_0 = arith.constant 0 : i32
    %c0_i32_1 = arith.constant 0 : i32
    return %c0_i32, %c0_i32_0 : i32, i32
  }
  func.func @transform_7(%arg0: i32) -> (i32, i32, i32) {
    %c0_i32 = arith.constant 0 : i32
    %c0_i32_0 = arith.constant 0 : i32
    %c0_i32_1 = arith.constant 0 : i32
    return %arg0, %c0_i32, %c0_i32_0 : i32, i32, i32
  }
}

</mosaic_0001>

<bundles_post_ra>
// kernel: reward_model_forward.1
= control target key start
LH: loop header
LB: loop body
LE: loop exit
PB: predicated region body
PF: predicated region fallthrough
CT: control target
= control target key end

     0   :  { %s1368_s26 = smov 0   ;;  %s1738_s0 = inlined_call_operand.vmem [shape: f32[2,1,128], index: 0, kind: input, shape index: {}]   ;;  %s1739_s1 = inlined_call_operand.vmem [shape: f32[128,1], index: 1, kind: input, shape index: {}]   ;;  %s1740_s2 = inlined_call_operand.vmem [shape: f32[128,1], index: 2, kind: input, shape index: {}]   ;;  %s1741_s3 = inlined_call_operand.vmem [shape: bf16[256,128], index: 3, kind: input, shape index: {}]   ;;  %s1742_s4 = inlined_call_operand.vmem [shape: f32[256,1], index: 4, kind: input, shape index: {}]   ;;  %s1743_s5 = inlined_call_operand.vmem [shape: bf16[1,256], index: 5, kind: input, shape index: {}]   ;;  %s1744_s6 = inlined_call_operand.<no memory space> [shape: f32[1,1], index: 6, kind: input, shape index: {}]   ;;  %s1745_s7 = inlined_call_operand.vmem [shape: f32[2,1,128], index: 7, kind: output, shape index: {}]  }
   0x1   :  { %12 = sst [smem:[#allocation2]] %s1744_s6 }
   0x2 LB: > { %s1168_s27 = sadd.s32 4294967295, %s1321_s26   ;;  %p1172_p0 = scmp.ge.s32.totalorder %s1321_s26, 1  ;;  %s1321_s26 = sphi %s1368_s26, %s18_s26  }
   0x3   : > { %p236_p1 = scmp.lt.s32.totalorder %s1321_s26, 3 }
   0x5   : > { %p237_p2 = pnand %p1172_p0, %p236_p1 }
   0x6   : > { %v390_v0 = vld [vmem:[%s1740_s2] sm:$0xff] (!%p237_p2)  ;;  %v1323_v2 = vmov (!%p237_p2), 0   ;;  %v391_v3 = vld [vmem:[%s1740_s2 + $0x8] sm:$0xff] (!%p237_p2)  ;;  %v275_v5 = vld [vmem:[%s1739_s1 + $0x18] sm:$0xff] (!%p237_p2)  ;;  %p264_p3 = scmp.lt.s32.totalorder (!%p237_p2), %s1168_s27, 1  ;;  %s1056_s15 = sld [smem:[#allocation2]] (!%p237_p2) }
   0x7   : > { %240 = sbr.rel (%p237_p2) target bundleno = 709 (0x2c5), region = 48  ;;  %v272_v1 = vld [vmem:[%s1739_s1] sm:$0xff] (!%p237_p2)  ;;  %1298 = vset.pattern.permute.xlu1 (!%p237_p2), %v1323_v2  ;;  %1297 = vset.pattern.permute.xlu0 (!%p237_p2), %v1323_v2  ;;  %v273_v4 = vld [vmem:[%s1739_s1 + $0x8] sm:$0xff] (!%p237_p2)  ;;  %v274_v6 = vld [vmem:[%s1739_s1 + $0x10] sm:$0xff] (!%p237_p2) }
   0x8   : > { %408 = vperm.xlu1 (!%p237_p2), %1298, %v390_v0   ;;  %290 = vperm.xlu0 (!%p237_p2), %1297, %v272_v1   ;;  %v393_v7 = vld [vmem:[%s1740_s2 + $0x18] sm:$0xff] (!%p237_p2)  ;;  %v392_v8 = vld [vmem:[%s1740_s2 + $0x10] sm:$0xff] (!%p237_p2)  ;;  %v277_v9 = vld [vmem:[%s1739_s1 + $0x28] sm:$0xff] (!%p237_p2) }
   0x9   : > { %v276_v10 = vld [vmem:[%s1739_s1 + $0x20] sm:$0xff] (!%p237_p2)  ;;  %v395_v11 = vld [vmem:[%s1740_s2 + $0x28] sm:$0xff] (!%p237_p2)  ;;  %v279_v13 = vld [vmem:[%s1739_s1 + $0x38] sm:$0xff] (!%p237_p2) }
   0xa   : > { %v394_v12 = vld [vmem:[%s1740_s2 + $0x20] sm:$0xff] (!%p237_p2)  ;;  %v278_v14 = vld [vmem:[%s1739_s1 + $0x30] sm:$0xff] (!%p237_p2)  ;;  %v397_v15 = vld [vmem:[%s1740_s2 + $0x38] sm:$0xff] (!%p237_p2) }
   0xb   : > { %v396_v16 = vld [vmem:[%s1740_s2 + $0x30] sm:$0xff] (!%p237_p2)  ;;  %v281_v17 = vld [vmem:[%s1739_s1 + $0x48] sm:$0xff] (!%p237_p2)  ;;  %v280_v18 = vld [vmem:[%s1739_s1 + $0x40] sm:$0xff] (!%p237_p2) }
   0xc   : > { %413 = vperm.xlu1 (!%p237_p2), %1298, %v391_v3   ;;  %295 = vperm.xlu0 (!%p237_p2), %1297, %v273_v4   ;;  %v399_v19 = vld [vmem:[%s1740_s2 + $0x48] sm:$0xff] (!%p237_p2)  ;;  %v398_v20 = vld [vmem:[%s1740_s2 + $0x40] sm:$0xff] (!%p237_p2)  ;;  %v283_v21 = vld [vmem:[%s1739_s1 + $0x58] sm:$0xff] (!%p237_p2) }
   0xd   : > { %v282_v22 = vld [vmem:[%s1739_s1 + $0x50] sm:$0xff] (!%p237_p2)  ;;  %v401_v23 = vld [vmem:[%s1740_s2 + $0x58] sm:$0xff] (!%p237_p2)  ;;  %v285_v25 = vld [vmem:[%s1739_s1 + $0x68] sm:$0xff] (!%p237_p2) }
   0xe   : > { %v400_v24 = vld [vmem:[%s1740_s2 + $0x50] sm:$0xff]  ;;  %v284_v26 = vld [vmem:[%s1739_s1 + $0x60] sm:$0xff]  ;;  %v403_v27 = vld [vmem:[%s1740_s2 + $0x68] sm:$0xff]  ;;  %s1747_s27 = smov (!%p264_p3, %s1168_s27), 1 }
   0xf   : > { %v402_v28 = vld [vmem:[%s1740_s2 + $0x60] sm:$0xff]  ;;  %v287_v29 = vld [vmem:[%s1739_s1 + $0x78] sm:$0xff]  ;;  %v286_v30 = vld [vmem:[%s1739_s1 + $0x70] sm:$0xff]  ;;  %s266_s28 = scalar_lea.vmem %s1738_s0, %s1747_s27  ;;  %s269_s18 = scalar_lea.vmem %s1745_s7, %s1747_s27 }
  0x10   : > { %305 = vperm.xlu1 %1298, %v275_v5   ;;  %300 = vperm.xlu0 %1297, %v274_v6   ;;  %v405_v31 = vld [vmem:[%s1740_s2 + $0x78] sm:$0xff]  ;;  %v404_v32 = vld [vmem:[%s1740_s2 + $0x70] sm:$0xff]  ;;  %v575_v33 = vld [vmem:[%s1742_s4 + $0x88] sm:$0xff] }
  0x11   : > { %v574_v34 = vld [vmem:[%s1742_s4 + $0x80] sm:$0xff]  ;;  %v559_v35 = vld [vmem:[%s1742_s4 + $0x8] sm:$0xff]  ;;  %v577_v38 = vld [vmem:[%s1742_s4 + $0x98] sm:$0xff] }
  0x12   : > { %v558_v36 = vld [vmem:[%s1742_s4] sm:$0xff]  ;;  %v576_v39 = vld [vmem:[%s1742_s4 + $0x90] sm:$0xff]  ;;  %v561_v40 = vld [vmem:[%s1742_s4 + $0x18] sm:$0xff] }
  0x13   : > { %v1299_v37 = vld [vmem:[%s1741_s3] sm:$0xff]   ;;  %v560_v41 = vld [vmem:[%s1742_s4 + $0x10] sm:$0xff]  ;;  %v579_v42 = vld [vmem:[%s1742_s4 + $0xa8] sm:$0xff] }
  0x14   : > { %423 = vperm.xlu1 %1298, %v393_v7   ;;  %418 = vperm.xlu0 %1297, %v392_v8   ;;  %v578_v43 = vld [vmem:[%s1742_s4 + $0xa0] sm:$0xff]  ;;  %v563_v44 = vld [vmem:[%s1742_s4 + $0x28] sm:$0xff]  ;;  %v581_v46 = vld [vmem:[%s1742_s4 + $0xb8] sm:$0xff] }
  0x15   : > { %1255 = vmatprep.mubr.bf16.mxu0 %v1299_v37  ;;  %v562_v45 = vld [vmem:[%s1742_s4 + $0x20] sm:$0xff]  ;;  %v580_v47 = vld [vmem:[%s1742_s4 + $0xb0] sm:$0xff]  ;;  %v565_v48 = vld [vmem:[%s1742_s4 + $0x38] sm:$0xff] }
  0x16   : > { %v564_v49 = vld [vmem:[%s1742_s4 + $0x30] sm:$0xff]  ;;  %v583_v50 = vld [vmem:[%s1742_s4 + $0xc8] sm:$0xff]  ;;  %v582_v51 = vld [vmem:[%s1742_s4 + $0xc0] sm:$0xff] }
  0x17   : > { %v567_v52 = vld [vmem:[%s1742_s4 + $0x48] sm:$0xff]  ;;  %v566_v53 = vld [vmem:[%s1742_s4 + $0x40] sm:$0xff]  ;;  %v585_v54 = vld [vmem:[%s1742_s4 + $0xd8] sm:$0xff] }
  0x18   : > { %315 = vperm.xlu1 %1298, %v277_v9   ;;  %310 = vperm.xlu0 %1297, %v276_v10   ;;  %v584_v55 = vld [vmem:[%s1742_s4 + $0xd0] sm:$0xff]  ;;  %v569_v56 = vld [vmem:[%s1742_s4 + $0x58] sm:$0xff]  ;;  %v587_v58 = vld [vmem:[%s1742_s4 + $0xe8] sm:$0xff] }
  0x19   : > { %v568_v57 = vld [vmem:[%s1742_s4 + $0x50] sm:$0xff]  ;;  %v586_v59 = vld [vmem:[%s1742_s4 + $0xe0] sm:$0xff]  ;;  %v571_v60 = vld [vmem:[%s1742_s4 + $0x68] sm:$0xff] }
  0x1a   : > { %v570_v61 = vld [vmem:[%s1742_s4 + $0x60] sm:$0xff]  ;;  %v589_v62 = vld [vmem:[%s1742_s4 + $0xf8] sm:$0xff]  ;;  %v588_v63 = vld [vmem:[%s1742_s4 + $0xf0] sm:$0xff] }
  0x1b   : > { %v573_v0 = vld [vmem:[%s1742_s4 + $0x78] sm:$0xff]  ;;  %v572_v1 = vld [vmem:[%s1742_s4 + $0x70] sm:$0xff]  ;;  %v1581_v2 = vld [vmem:[%s266_s28] ss:$0 sm:$0xff] }
  0x1c   : > { %433 = vperm.xlu1 %1298, %v395_v11   ;;  %428 = vperm.xlu0 %1297, %v394_v12  }
  0x20   : > { %325 = vperm.xlu1 %1298, %v279_v13   ;;  %320 = vperm.xlu0 %1297, %v278_v14  }
  0x24   : > { %443 = vperm.xlu1 %1298, %v397_v15   ;;  %438 = vperm.xlu0 %1297, %v396_v16  }
  0x28   : > { %335 = vperm.xlu1 %1298, %v281_v17   ;;  %330 = vperm.xlu0 %1297, %v280_v18  }
  0x2c   : > { %453 = vperm.xlu1 %1298, %v399_v19   ;;  %448 = vperm.xlu0 %1297, %v398_v20  }
  0x30   : > { %345 = vperm.xlu1 %1298, %v283_v21   ;;  %340 = vperm.xlu0 %1297, %v282_v22  }
  0x34   : > { %463 = vperm.xlu1 %1298, %v401_v23   ;;  %458 = vperm.xlu0 %1297, %v400_v24  }
  0x38   : > { %355 = vperm.xlu1 %1298, %v285_v25   ;;  %350 = vperm.xlu0 %1297, %v284_v26  }
  0x3c   : > { %473 = vperm.xlu1 %1298, %v403_v27   ;;  %468 = vperm.xlu0 %1297, %v402_v28  }
  0x40   : > { %365 = vperm.xlu1 %1298, %v287_v29   ;;  %360 = vperm.xlu0 %1297, %v286_v30  }
  0x44   : > { %483 = vperm.xlu1 %1298, %v405_v31   ;;  %478 = vperm.xlu0 %1297, %v404_v32  }
  0x48   : > { %677 = vperm.xlu1 %1298, %v575_v33   ;;  %672 = vperm.xlu0 %1297, %v574_v34  }
  0x4c   : > { %597 = vperm.xlu1 %1298, %v559_v35   ;;  %592 = vperm.xlu0 %1297, %v558_v36  }
  0x50   : > { %687 = vperm.xlu1 %1298, %v577_v38   ;;  %682 = vperm.xlu0 %1297, %v576_v39  }
  0x54   : > { %607 = vperm.xlu1 %1298, %v561_v40   ;;  %602 = vperm.xlu0 %1297, %v560_v41  }
  0x58   : > { %697 = vperm.xlu1 %1298, %v579_v42   ;;  %692 = vperm.xlu0 %1297, %v578_v43  }
  0x5c   : > { %617 = vperm.xlu1 %1298, %v563_v44   ;;  %612 = vperm.xlu0 %1297, %v562_v45  }
  0x60   : > { %707 = vperm.xlu1 %1298, %v581_v46   ;;  %702 = vperm.xlu0 %1297, %v580_v47  }
  0x64   : > { %627 = vperm.xlu1 %1298, %v565_v48   ;;  %622 = vperm.xlu0 %1297, %v564_v49  }
  0x68   : > { %717 = vperm.xlu1 %1298, %v583_v50   ;;  %712 = vperm.xlu0 %1297, %v582_v51  }
  0x6c   : > { %637 = vperm.xlu1 %1298, %v567_v52   ;;  %632 = vperm.xlu0 %1297, %v566_v53  }
  0x70   : > { %727 = vperm.xlu1 %1298, %v585_v54   ;;  %722 = vperm.xlu0 %1297, %v584_v55  }
  0x74   : > { %647 = vperm.xlu1 %1298, %v569_v56   ;;  %642 = vperm.xlu0 %1297, %v568_v57  }
  0x78   : > { %737 = vperm.xlu1 %1298, %v587_v58   ;;  %732 = vperm.xlu0 %1297, %v586_v59  }
  0x7c   : > { %657 = vperm.xlu1 %1298, %v571_v60   ;;  %652 = vperm.xlu0 %1297, %v570_v61  }
  0x80   : > { %747 = vperm.xlu1 %1298, %v589_v62   ;;  %742 = vperm.xlu0 %1297, %v588_v63  }
  0x84   : > { %667 = vperm.xlu1 %1298, %v573_v0   ;;  %662 = vperm.xlu0 %1297, %v572_v1  }
  0x87   : > { %v409_v3 = vpop.permute.xlu1 %408  ;;  %v291_v4 = vpop.permute.xlu0 %290 }
  0x88   : > { %v374_v5 = vmul.f32 %v1581_v2, %v291_v4 }
  0x8a   : > { %v486_v8 = vadd.f32 %v409_v3, %v374_v5 }
  0x8b   : > { %v414_v6 = vpop.permute.xlu1 %413  ;;  %v296_v7 = vpop.permute.xlu0 %295 }
  0x8c   : > { %v375_v9 = vmul.f32 %v1581_v2, %v296_v7  ;;  %v502_v13 = vmax.f32 %v486_v8, 0.0 }
  0x8e   : > { %v487_v10 = vadd.f32 %v414_v6, %v375_v9 }
  0x8f   : > { %v306_v11 = vpop.permute.xlu1 %305  ;;  %v301_v12 = vpop.permute.xlu0 %300 }
  0x90   : > { %v503_v14 = vmax.f32 %v487_v10, 0.0  ;;  %v377_v15 = vmul.f32 %v1581_v2, %v306_v11  ;;  %v376_v16 = vmul.f32 %v1581_v2, %v301_v12 }
  0x92   : > { %v550_v17 = vpack.c.bf16 %v503_v14, %v502_v13 }
  0x93   : > { %v424_v18 = vpop.permute.xlu1 %423  ;;  %v419_v19 = vpop.permute.xlu0 %418 }
  0x94   : > { %v489_v20 = vadd.f32 %v424_v18, %v377_v15  ;;  %v488_v21 = vadd.f32 %v419_v19, %v376_v16  ;;  %1239 = vmatprep.subr.bf16.mxu0 %v550_v17 }
  0x95   : > { %1240 = vmatpush3.bf16.msra.mxu0 %v550_v17 }
  0x96   : > { %v505_v22 = vmax.f32 %v489_v20, 0.0  ;;  %v504_v23 = vmax.f32 %v488_v21, 0.0 }
  0x97   : > { %v316_v24 = vpop.permute.xlu1 %315  ;;  %v311_v25 = vpop.permute.xlu0 %310 }
  0x98   : > { %v551_v26 = vpack.c.bf16 %v505_v22, %v504_v23  ;;  %v379_v27 = vmul.f32 %v1581_v2, %v316_v24  ;;  %v378_v28 = vmul.f32 %v1581_v2, %v311_v25 }
  0x9a   : > { %1241 = vmatprep.subr.bf16.mxu0 %v551_v26 }
  0x9b   : > { %v434_v29 = vpop.permute.xlu1 %433  ;;  %v429_v30 = vpop.permute.xlu0 %428  ;;  %1242 = vmatpush3.bf16.msra.mxu0 %v551_v26 }
  0x9c   : > { %v491_v31 = vadd.f32 %v434_v29, %v379_v27  ;;  %v490_v32 = vadd.f32 %v429_v30, %v378_v28  ;;  %v1300_v28 = vld [vmem:[%s1741_s3 + $0x8] sm:$0xff]   ;;  %v1301_v29 = vld [vmem:[%s1741_s3 + $0x10] sm:$0xff]   ;;  %v1303_v30 = vld [vmem:[%s1741_s3 + $0x20] sm:$0xff]  }
  0x9e   : > { %v507_v33 = vmax.f32 %v491_v31, 0.0  ;;  %v506_v34 = vmax.f32 %v490_v32, 0.0  ;;  %v1304_v31 = vld [vmem:[%s1741_s3 + $0x28] sm:$0xff]   ;;  %v1305_v32 = vld [vmem:[%s1741_s3 + $0x30] sm:$0xff]  }
  0x9f   : > { %v326_v35 = vpop.permute.xlu1 %325  ;;  %v321_v36 = vpop.permute.xlu0 %320 }
  0xa0   : > { %v552_v37 = vpack.c.bf16 %v507_v33, %v506_v34  ;;  %v381_v38 = vmul.f32 %v1581_v2, %v326_v35  ;;  %v380_v39 = vmul.f32 %v1581_v2, %v321_v36  ;;  %v1306_v33 = vld [vmem:[%s1741_s3 + $0x38] sm:$0xff]   ;;  %v1307_v34 = vld [vmem:[%s1741_s3 + $0x40] sm:$0xff]   ;;  %v1308_v35 = vld [vmem:[%s1741_s3 + $0x48] sm:$0xff]  }
  0xa1   : > { %v1309_v36 = vld [vmem:[%s1741_s3 + $0x50] sm:$0xff]  }
  0xa2   : > { %1243 = vmatprep.subr.bf16.mxu0 %v552_v37 }
  0xa3   : > { %v444_v40 = vpop.permute.xlu1 %443  ;;  %v439_v41 = vpop.permute.xlu0 %438  ;;  %1244 = vmatpush3.bf16.msra.mxu0 %v552_v37  ;;  %v1310_v37 = vld [vmem:[%s1741_s3 + $0x58] sm:$0xff]  }
  0xa4   : > { %v493_v42 = vadd.f32 %v444_v40, %v381_v38  ;;  %v492_v43 = vadd.f32 %v439_v41, %v380_v39  ;;  %v1311_v38 = vld [vmem:[%s1741_s3 + $0x60] sm:$0xff]   ;;  %v1312_v39 = vld [vmem:[%s1741_s3 + $0x68] sm:$0xff]   ;;  %v1313_v40 = vld [vmem:[%s1741_s3 + $0x70] sm:$0xff]  }
  0xa5   : > { %v1314_v41 = vld [vmem:[%s1741_s3 + $0x78] sm:$0xff]  }
  0xa6   : > { %v509_v44 = vmax.f32 %v493_v42, 0.0  ;;  %v508_v45 = vmax.f32 %v492_v43, 0.0 }
  0xa7   : > { %v336_v46 = vpop.permute.xlu1 %335  ;;  %v331_v47 = vpop.permute.xlu0 %330 }
  0xa8   : > { %v553_v48 = vpack.c.bf16 %v509_v44, %v508_v45  ;;  %v383_v49 = vmul.f32 %v1581_v2, %v336_v46  ;;  %v382_v50 = vmul.f32 %v1581_v2, %v331_v47  ;;  %v1324_v44 = vmov 1966171168  }
  0xa9   : > { %v1068_v45 = vunpack.c.l.s4 %v1324_v44  ;;  %v1070_v46 = vlaneseq }
  0xaa   : > { %1245 = vmatprep.subr.bf16.mxu0 %v553_v48 }
  0xab   : > { %v454_v51 = vpop.permute.xlu1 %453  ;;  %v449_v52 = vpop.permute.xlu0 %448  ;;  %1246 = vmatpush3.bf16.msra.mxu0 %v553_v48  ;;  %v1069_v47 = vunpack.c.0.s8 %v1068_v45  ;;  %v1071_v48 = vshrl.u32 %v1070_v46, 7 }
  0xac   : > { %v495_v53 = vadd.f32 %v454_v51, %v383_v49  ;;  %v494_v54 = vadd.f32 %v449_v52, %v382_v50  ;;  %v1651_v50 = vld.sshfl [vmem:[%s1743_s5] sm:$0x11 pattern:$0x75316420] }
  0xad   : > { %v1066_v51 = vcombine.high %v1651_v50, %v1651_v50  ;;  %v1655_v52 = vsub.s32 %v1069_v47, %v1071_v48 }
  0xae   : > { %v511_v55 = vmax.f32 %v495_v53, 0.0  ;;  %v510_v56 = vmax.f32 %v494_v54, 0.0 }
  0xaf   : > { %v346_v57 = vpop.permute.xlu1 %345  ;;  %v341_v58 = vpop.permute.xlu0 %340  ;;  %v1080_v54 = vrot.slane %v1066_v51, %v1655_v52 }
  0xb0   : > { %v554_v59 = vpack.c.bf16 %v511_v55, %v510_v56  ;;  %v385_v60 = vmul.f32 %v1581_v2, %v346_v57  ;;  %v384_v61 = vmul.f32 %v1581_v2, %v341_v58  ;;  %v1073_v55 = vrot.slane %v1651_v50, %v1655_v52 }
  0xb1   : > { %1115 = vmatprep.mubr.bf16.mxu1 %v1080_v54 }
  0xb2   : > { %1247 = vmatprep.subr.bf16.mxu0 %v554_v59 }
  0xb3   : > { %v464_v62 = vpop.permute.xlu1 %463  ;;  %v459_v63 = vpop.permute.xlu0 %458  ;;  %1248 = vmatpush3.bf16.msra.mxu0 %v554_v59 }
  0xb4   : > { %v497_v0 = vadd.f32 %v464_v62, %v385_v60  ;;  %v496_v1 = vadd.f32 %v459_v63, %v384_v61 }
  0xb6   : > { %v513_v3 = vmax.f32 %v497_v0, 0.0  ;;  %v512_v4 = vmax.f32 %v496_v1, 0.0 }
  0xb7   : > { %v356_v5 = vpop.permute.xlu1 %355  ;;  %v351_v6 = vpop.permute.xlu0 %350 }
  0xb8   : > { %v555_v7 = vpack.c.bf16 %v513_v3, %v512_v4  ;;  %v387_v8 = vmul.f32 %v1581_v2, %v356_v5  ;;  %v386_v9 = vmul.f32 %v1581_v2, %v351_v6 }
  0xba   : > { %1249 = vmatprep.subr.bf16.mxu0 %v555_v7 }
  0xbb   : > { %v474_v10 = vpop.permute.xlu1 %473  ;;  %v469_v11 = vpop.permute.xlu0 %468  ;;  %1250 = vmatpush3.bf16.msra.mxu0 %v555_v7 }
  0xbc   : > { %v499_v12 = vadd.f32 %v474_v10, %v387_v8  ;;  %v498_v13 = vadd.f32 %v469_v11, %v386_v9 }
  0xbe   : > { %v515_v14 = vmax.f32 %v499_v12, 0.0  ;;  %v514_v15 = vmax.f32 %v498_v13, 0.0 }
  0xbf   : > { %v366_v16 = vpop.permute.xlu1 %365  ;;  %v361_v17 = vpop.permute.xlu0 %360 }
  0xc0   : > { %v556_v18 = vpack.c.bf16 %v515_v14, %v514_v15  ;;  %v389_v19 = vmul.f32 %v1581_v2, %v366_v16  ;;  %v388_v20 = vmul.f32 %v1581_v2, %v361_v17  ;;  %v1302_v2 = vld [vmem:[%s1741_s3 + $0x18] sm:$0xff]  }
  0xc2   : > { %1251 = vmatprep.subr.bf16.mxu0 %v556_v18 }
  0xc3   : > { %v484_v21 = vpop.permute.xlu1 %483  ;;  %v479_v22 = vpop.permute.xlu0 %478  ;;  %1252 = vmatpush3.bf16.msra.mxu0 %v556_v18 }
  0xc4   : > { %v501_v23 = vadd.f32 %v484_v21, %v389_v19  ;;  %v500_v24 = vadd.f32 %v479_v22, %v388_v20 }
  0xc6   : > { %v517_v25 = vmax.f32 %v501_v23, 0.0  ;;  %v516_v26 = vmax.f32 %v500_v24, 0.0 }
  0xc7   : > { %v1644_v42 = vpop.permute.xlu0 %672  ;;  %v1646_v43 = vpop.permute.xlu1 %677 }
  0xc8   : > { %v557_v27 = vpack.c.bf16 %v517_v25, %v516_v26 }
  0xca   : > { %1253 = vmatprep.subr.bf16.mxu0 %v557_v27 }
  0xcb   : > { %1254 = vmatpush3.bf16.msra.mxu0 %v557_v27  ;;  %v593_v49 = vpop.permute.xlu0 %592  ;;  %v598_v53 = vpop.permute.xlu1 %597 }
  0xce   : > { %1256 = vmatmul.mubr.bf16.vlgmr.msra.gmra.mrb[0].mxu0 %v1300_v28 }
  0xcf   : > { %1259 = vmatprep.mubr.bf16.mxu0 %v1301_v29  ;;  %v1660_v56 = vpop.permute.xlu0 %682  ;;  %v1662_v57 = vpop.permute.xlu1 %687 }
  0xd3   : > { %v603_v58 = vpop.permute.xlu0 %602  ;;  %v608_v59 = vpop.permute.xlu1 %607 }
  0xd6   : > { %1260 = vmatmul.mubr.bf16.gmra.mrb[4].mxu0 %v1302_v2 }
  0xd7   : > { %1263 = vmatprep.mubr.bf16.mxu0 %v1303_v30  ;;  %v1664_v60 = vpop.permute.xlu0 %692  ;;  %v1666_v61 = vpop.permute.xlu1 %697 }
  0xdb   : > { %v613_v62 = vpop.permute.xlu0 %612  ;;  %v618_v63 = vpop.permute.xlu1 %617 }
  0xde   : > { %1264 = vmatmul.mubr.bf16.gmra.mrb[8].mxu0 %v1304_v31 }
  0xdf   : > { %1267 = vmatprep.mubr.bf16.mxu0 %v1305_v32  ;;  %v1668_v0 = vpop.permute.xlu0 %702  ;;  %v1670_v1 = vpop.permute.xlu1 %707 }
  0xe3   : > { %v623_v3 = vpop.permute.xlu0 %622  ;;  %v628_v4 = vpop.permute.xlu1 %627 }
  0xe6   : > { %1268 = vmatmul.mubr.bf16.gmra.mrb[12].mxu0 %v1306_v33 }
  0xe7   : > { %1271 = vmatprep.mubr.bf16.mxu0 %v1307_v34  ;;  %v1672_v5 = vpop.permute.xlu0 %712  ;;  %v1674_v6 = vpop.permute.xlu1 %717 }
  0xeb   : > { %v633_v7 = vpop.permute.xlu0 %632  ;;  %v638_v8 = vpop.permute.xlu1 %637 }
  0xee   : > { %1272 = vmatmul.mubr.bf16.gmra.mrb[16].mxu0 %v1308_v35 }
  0xef   : > { %1275 = vmatprep.mubr.bf16.mxu0 %v1309_v36  ;;  %v1676_v9 = vpop.permute.xlu0 %722  ;;  %v1678_v10 = vpop.permute.xlu1 %727 }
  0xf3   : > { %v643_v11 = vpop.permute.xlu0 %642  ;;  %v648_v15 = vpop.permute.xlu1 %647 }
  0xf6   : > { %1276 = vmatmul.mubr.bf16.gmra.mrb[20].mxu0 %v1310_v37 }
  0xf7   : > { %1279 = vmatprep.mubr.bf16.mxu0 %v1311_v38  ;;  %v1680_v23 = vpop.permute.xlu0 %732  ;;  %v1684_v27 = vpop.permute.xlu1 %737 }
  0xfb   : > { %v653_v35 = vpop.permute.xlu0 %652 }
  0xfe   : > { %1280 = vmatmul.mubr.bf16.gmra.mrb[24].mxu0 %v1312_v39  ;;  %v658_v39 = vpop.permute.xlu1 %657 }
  0xff   : > { %1283 = vmatprep.mubr.bf16.mxu0 %v1313_v40 }
 0x106   : > { %1284 = vmatmul.mubr.bf16.gmra.mrb[28].mxu0 %v1314_v41 }
 0x1a1   : > { %v1257_v12 = vpop.f32.mrb[0].mxu0 }
 0x1a2   : > { %v889_v13 = vadd.f32 %v1257_v12, %v603_v58  ;;  %v880_v14 = vpop.f32.mrb[1].mxu0 }
 0x1a3   : > { %v881_v16 = vadd.f32 %v880_v14, %v593_v49  ;;  %v1258_v17 = vpop.f32.mrb[2].mxu0  ;;  %v1692_v49 = vpop.permute.xlu0 %742 }
 0x1a4   : > { %v892_v18 = vadd.f32 %v1258_v17, %v608_v59  ;;  %v883_v19 = vpop.f32.mrb[3].mxu0  ;;  %v1009_v21 = vmax.f32 %v889_v13, 0.0  ;;  %v1694_v59 = vpop.permute.xlu1 %747 }
 0x1a5   : > { %v884_v20 = vadd.f32 %v883_v19, %v598_v53  ;;  %v1007_v24 = vmax.f32 %v881_v16, 0.0 }
 0x1a6   : > { %v1010_v22 = vmax.f32 %v892_v18, 0.0 }
 0x1a7   : > { %v1008_v25 = vmax.f32 %v884_v20, 0.0  ;;  %v663_v14 = vpop.permute.xlu0 %662 }
 0x1a8   : > { %v1682_v26 = vpack.c.bf16 %v1010_v22, %v1009_v21  ;;  %v668_v19 = vpop.permute.xlu1 %667 }
 0x1a9   : > { %v1261_v28 = vpop.f32.mrb[4].mxu0  ;;  %v1686_v29 = vpack.c.bf16 %v1008_v25, %v1007_v24 }
 0x1aa   : > { %v905_v2 = vadd.f32 %v1261_v28, %v623_v3  ;;  %v896_v30 = vpop.f32.mrb[5].mxu0 }
 0x1ab   : > { %v897_v31 = vadd.f32 %v896_v30, %v613_v62  ;;  %v1262_v32 = vpop.f32.mrb[6].mxu0 }
 0x1ac   : > { %v908_v33 = vadd.f32 %v1262_v32, %v628_v4  ;;  %v899_v34 = vpop.f32.mrb[7].mxu0  ;;  %v1013_v37 = vmax.f32 %v905_v2, 0.0 }
 0x1ad   : > { %v900_v36 = vadd.f32 %v899_v34, %v618_v63  ;;  %v1011_v40 = vmax.f32 %v897_v31, 0.0 }
 0x1ae   : > { %v1014_v38 = vmax.f32 %v908_v33, 0.0 }
 0x1af   : > { %v1012_v41 = vmax.f32 %v900_v36, 0.0 }
 0x1b0   : > { %v1688_v44 = vpack.c.bf16 %v1014_v38, %v1013_v37 }
 0x1b1   : > { %v1690_v45 = vpack.c.bf16 %v1012_v41, %v1011_v40  ;;  %v1265_v46 = vpop.f32.mrb[8].mxu0 }
 0x1b2   : > { %v921_v47 = vadd.f32 %v1265_v46, %v643_v11  ;;  %v912_v48 = vpop.f32.mrb[9].mxu0 }
 0x1b3   : > { %v913_v51 = vadd.f32 %v912_v48, %v633_v7  ;;  %v1266_v53 = vpop.f32.mrb[10].mxu0 }
 0x1b4   : > { %v924_v54 = vadd.f32 %v1266_v53, %v648_v15  ;;  %v915_v58 = vpop.f32.mrb[11].mxu0  ;;  %v1017_v63 = vmax.f32 %v921_v47, 0.0 }
 0x1b5   : > { %v916_v62 = vadd.f32 %v915_v58, %v638_v8  ;;  %v1015_v4 = vmax.f32 %v913_v51, 0.0 }
 0x1b6   : > { %v1018_v3 = vmax.f32 %v924_v54, 0.0 }
 0x1b7   : > { %v1016_v12 = vmax.f32 %v916_v62, 0.0 }
 0x1b8   : > { %v1696_v13 = vpack.c.bf16 %v1018_v3, %v1017_v63 }
 0x1b9   : > { %v1698_v16 = vpack.c.bf16 %v1016_v12, %v1015_v4  ;;  %v1269_v11 = vpop.f32.mrb[12].mxu0 }
 0x1ba   : > { %v937_v17 = vadd.f32 %v1269_v11, %v663_v14  ;;  %v928_v18 = vpop.f32.mrb[13].mxu0 }
 0x1bb   : > { %v929_v7 = vadd.f32 %v928_v18, %v653_v35  ;;  %v1270_v20 = vpop.f32.mrb[14].mxu0 }
 0x1bc   : > { %v940_v15 = vadd.f32 %v1270_v20, %v668_v19  ;;  %v931_v21 = vpop.f32.mrb[15].mxu0  ;;  %v1021_v24 = vmax.f32 %v937_v17, 0.0 }
 0x1bd   : > { %v932_v22 = vadd.f32 %v931_v21, %v658_v39  ;;  %v1019_v25 = vmax.f32 %v929_v7, 0.0 }
 0x1be   : > { %v1022_v8 = vmax.f32 %v940_v15, 0.0 }
 0x1bf   : > { %v1020_v28 = vmax.f32 %v932_v22, 0.0 }
 0x1c0   : > { %v1700_v2 = vpack.c.bf16 %v1022_v8, %v1021_v24 }
 0x1c1   : > { %v1702_v30 = vpack.c.bf16 %v1020_v28, %v1019_v25  ;;  %v1273_v31 = vpop.f32.mrb[16].mxu0 }
 0x1c2   : > { %v953_v32 = vadd.f32 %v1273_v31, %v1660_v56  ;;  %v944_v33 = vpop.f32.mrb[17].mxu0 }
 0x1c3   : > { %v945_v34 = vadd.f32 %v944_v33, %v1644_v42  ;;  %v1274_v36 = vpop.f32.mrb[18].mxu0 }
 0x1c4   : > { %v956_v35 = vadd.f32 %v1274_v36, %v1662_v57  ;;  %v947_v37 = vpop.f32.mrb[19].mxu0  ;;  %v1025_v39 = vmax.f32 %v953_v32, 0.0 }
 0x1c5   : > { %v948_v38 = vadd.f32 %v947_v37, %v1646_v43  ;;  %v1023_v41 = vmax.f32 %v945_v34, 0.0 }
 0x1c6   : > { %v1026_v40 = vmax.f32 %v956_v35, 0.0 }
 0x1c7   : > { %v1024_v46 = vmax.f32 %v948_v38, 0.0 }
 0x1c8   : > { %v1049_v47 = vpack.c.bf16 %v1026_v40, %v1025_v39 }
 0x1c9   : > { %v1277_v48 = vpop.f32.mrb[20].mxu0  ;;  %v1048_v51 = vpack.c.bf16 %v1024_v46, %v1023_v41 }
 0x1ca   : > { %v969_v53 = vadd.f32 %v1277_v48, %v1668_v0  ;;  %v960_v54 = vpop.f32.mrb[21].mxu0 }
 0x1cb   : > { %v961_v56 = vadd.f32 %v960_v54, %v1664_v60  ;;  %v1278_v58 = vpop.f32.mrb[22].mxu0  ;;  %1217 = vmatprep.subr.bf16.mxu1 %v1048_v51 }
 0x1cc   : > { %v972_v42 = vadd.f32 %v1278_v58, %v1670_v1  ;;  %v963_v57 = vpop.f32.mrb[23].mxu0  ;;  %1218 = vmatpush3.bf16.msra.mxu1 %v1686_v29  ;;  %v1029_v62 = vmax.f32 %v969_v53, 0.0 }
 0x1cd   : > { %v964_v43 = vadd.f32 %v963_v57, %v1666_v61  ;;  %1219 = vmatprep.subr.bf16.mxu1 %v1049_v47  ;;  %v1027_v3 = vmax.f32 %v961_v56, 0.0 }
 0x1ce   : > { %v1030_v63 = vmax.f32 %v972_v42, 0.0 }
 0x1cf   : > { %v1028_v4 = vmax.f32 %v964_v43, 0.0 }
 0x1d0   : > { %v1051_v12 = vpack.c.bf16 %v1030_v63, %v1029_v62  ;;  %1220 = vmatpush3.bf16.msra.mxu1 %v1682_v26 }
 0x1d1   : > { %v1050_v0 = vpack.c.bf16 %v1028_v4, %v1027_v3  ;;  %v1281_v14 = vpop.f32.mrb[24].mxu0 }
 0x1d2   : > { %v985_v60 = vadd.f32 %v1281_v14, %v1676_v9  ;;  %v976_v11 = vpop.f32.mrb[25].mxu0 }
 0x1d3   : > { %v977_v1 = vadd.f32 %v976_v11, %v1672_v5  ;;  %v1282_v17 = vpop.f32.mrb[26].mxu0  ;;  %1221 = vmatprep.subr.bf16.mxu1 %v1050_v0 }
 0x1d4   : > { %v988_v29 = vadd.f32 %v1282_v17, %v1678_v10  ;;  %v979_v61 = vpop.f32.mrb[27].mxu0  ;;  %1222 = vmatpush3.bf16.msra.mxu1 %v1690_v45  ;;  %v1033_v19 = vmax.f32 %v985_v60, 0.0 }
 0x1d5   : > { %v980_v18 = vadd.f32 %v979_v61, %v1674_v6  ;;  %1223 = vmatprep.subr.bf16.mxu1 %v1051_v12  ;;  %v1031_v26 = vmax.f32 %v977_v1, 0.0 }
 0x1d6   : > { %v1034_v7 = vmax.f32 %v988_v29, 0.0 }
 0x1d7   : > { %v1032_v20 = vmax.f32 %v980_v18, 0.0 }
 0x1d8   : > { %v1053_v15 = vpack.c.bf16 %v1034_v7, %v1033_v19  ;;  %1224 = vmatpush3.bf16.msra.mxu1 %v1688_v44 }
 0x1d9   : > { %v1052_v9 = vpack.c.bf16 %v1032_v20, %v1031_v26  ;;  %v1285_v21 = vpop.f32.mrb[28].mxu0 }
 0x1da   : > { %v1001_v5 = vadd.f32 %v1285_v21, %v1692_v49  ;;  %v992_v22 = vpop.f32.mrb[29].mxu0 }
 0x1db   : > { %v993_v10 = vadd.f32 %v992_v22, %v1680_v23  ;;  %v1286_v24 = vpop.f32.mrb[30].mxu0  ;;  %1225 = vmatprep.subr.bf16.mxu1 %v1052_v9 }
 0x1dc   : > { %v1004_v45 = vadd.f32 %v1286_v24, %v1694_v59  ;;  %v995_v6 = vpop.f32.mrb[31].mxu0  ;;  %1226 = vmatpush3.bf16.msra.mxu1 %v1698_v16  ;;  %v1037_v25 = vmax.f32 %v1001_v5, 0.0 }
 0x1dd   : > { %v996_v8 = vadd.f32 %v995_v6, %v1684_v27  ;;  %1227 = vmatprep.subr.bf16.mxu1 %v1053_v15  ;;  %v1035_v44 = vmax.f32 %v993_v10, 0.0  ;;  %v1057_v27 = vstv %s1056_s15 }
 0x1de   : > { %v1038_v28 = vmax.f32 %v1004_v45, 0.0 }
 0x1df   : > { %v1036_v31 = vmax.f32 %v996_v8, 0.0 }
 0x1e0   : > { %v1055_v32 = vpack.c.bf16 %v1038_v28, %v1037_v25  ;;  %1228 = vmatpush3.bf16.msra.mxu1 %v1696_v13 }
 0x1e1   : > { %v1054_v49 = vpack.c.bf16 %v1036_v31, %v1035_v44 }
 0x1e3   : > { %1229 = vmatprep.subr.bf16.mxu1 %v1054_v49 }
 0x1e4   : > { %1230 = vmatpush3.bf16.msra.mxu1 %v1702_v30 }
 0x1e5   : > { %1231 = vmatprep.subr.bf16.mxu1 %v1055_v32 }
 0x1e8   : > { %1232 = vmatpush3.bf16.msra.mxu1 %v1700_v2 }
 0x1eb   : > { %1116 = vmatmul.mubr.bf16.vlgmr.msra.gmra.mrb[0].mxu1 %v1073_v55 }
 0x2be   : > { %v1233_v23 = vpop.f32.mrb[0].mxu1 }
 0x2bf   : > { %v1234_v59 = vpop.f32.mrb[1].mxu1 }
 0x2c0   : > { %v1235_v16 = vadd.f32 %v1234_v59, %v1233_v23  ;;  %v1236_v33 = vpop.f32.mrb[2].mxu1 }
 0x2c1   : > { %v1237_v13 = vpop.f32.mrb[3].mxu1 }
 0x2c2   : > { %v1118_v34 = vadd.f32 %v1235_v16, %v1057_v27 }
 0x2c4   : > { %1123 = vst [vmem:[%s269_s18] sm:$0x1] %v1118_v34 }
 0x2c5 PF: > { %s18_s26 = sadd.s32 1, %s1321_s26  }
 0x2c6   : > { %p15_p4 = scmp.ge.s32.totalorder %s18_s26, 4  }
 0x2c8   :  { %17 = sbr.rel (!%p15_p4) target bundleno = 2 (0x2), region = 78 }

</bundles_post_ra>
